<compile_context>
chip_gen: v6e
topology: v6e:2x2x1
jax: 0.10.0
libtpu: 0.0.40
codegen_flags: <defaults>
</compile_context>

<pallas_src>
import jax
import jax.numpy as jnp
from jax.experimental import pallas as pl
from jax.experimental.pallas import tpu as pltpu

# num_slot_labels from the reference script: 'o' + 20 non-'o' slots = 21 labels
NUM_SLOT_LABELS = 21


def _round_up(x, m):
    return ((x + m - 1) // m) * m


def _slot_classifier_kernel(x_ref, w_ref, b_ref, o_ref):
    # dropout with rate 0.0 is the identity in both train and eval -> no-op.
    acc = jnp.dot(x_ref[...], w_ref[...], preferred_element_type=jnp.float32)  # MXU, f32 acc
    o_ref[...] = (acc + b_ref[...]).astype(o_ref.dtype)


def slot_classifier_forward(x, weight, bias, *, tm=1024):
    """x: (batch, seq, hidden); weight: (num_labels, hidden) [PyTorch layout];
    bias: (num_labels,). Returns (batch, seq, num_labels) in x.dtype."""
    batch, seq, hidden = x.shape
    num_labels = weight.shape[0]
    M = batch * seq

    # TODO(synk): for tiny M*hidden (like the toy shapes below) plain XLA would beat the
    # per-call Pallas overhead; we always take the kernel path so it is exercised.

    N_pad = _round_up(max(num_labels, 128), 128)  # lane-dense output (unmasked vst)
    x_it = jnp.dtype(x.dtype).itemsize
    out_dtype = x.dtype
    o_it = jnp.dtype(out_dtype).itemsize

    # --- activations: only a <=7-row sublane-alignment pad; no K padding, no tm padding ---
    x2d = x.reshape(M, hidden)
    M8 = _round_up(M, 8)
    if M8 != M:
        x2d = jnp.pad(x2d, ((0, M8 - M), (0, 0)))

    # --- tiny parameters: weight (hidden, N_pad) zero-padded on the label axis only ---
    w_t = jnp.zeros((hidden, N_pad), dtype=x.dtype).at[:, :num_labels].set(
        weight.T.astype(x.dtype))
    b2d = jnp.zeros((1, N_pad), dtype=jnp.float32).at[:, :num_labels].set(
        bias.astype(jnp.float32))

    # --- generation-aware VMEM budget (v7x: 64 MiB physical, v5e/v6e: 128 MiB) ---
    try:
        vmem_physical = int(pltpu.get_tpu_info().vmem_capacity_bytes)
    except Exception:
        vmem_physical = 64 * 1024 * 1024  # conservative (v7x-sized) fallback
    vmem_budget = (vmem_physical * 3) // 4  # ~48 MiB on v7x, ~96 MiB on v5e/v6e

    def footprint(t):
        # double-buffered x + out streams, weight/bias counted at 2 bufs (worst case)
        return (2 * t * hidden * x_it
                + 2 * t * N_pad * o_it
                + 2 * hidden * N_pad * x_it
                + 2 * N_pad * 4)

    # --- tile selection: start big (roofline-friendly), shrink only if VMEM-bound ---
    tm_eff = max(8, _round_up(min(tm, M8), 8))
    while tm_eff > 256 and footprint(tm_eff) > vmem_budget:
        tm_eff = _round_up(max(256, tm_eff // 2), 8)
    tm_eff = min(tm_eff, M8)

    # guarantee >=2 grid steps when there is enough work so v7x's two TensorCores
    # both stream M tiles (harmless on single-TC v5e/v6e).
    if 8 < M8 <= 2 * tm_eff:
        tm_eff = min(tm_eff, _round_up(pl.cdiv(M8, 2), 8))

    grid_m = pl.cdiv(M8, tm_eff)
    vmem_limit = int(min(vmem_budget, max(footprint(tm_eff) + (2 << 20), 16 << 20)))

    cost = pl.CostEstimate(
        flops=2 * M8 * hidden * N_pad,
        transcendentals=0,
        bytes_accessed=(M8 * hidden * x_it + hidden * N_pad * x_it
                        + M8 * N_pad * o_it + N_pad * 4),
    )

    def build(const_pipeline_mode):
        const_kwargs = {} if const_pipeline_mode is None else {
            "pipeline_mode": const_pipeline_mode}
        return pl.pallas_call(
            _slot_classifier_kernel,
            out_shape=jax.ShapeDtypeStruct((M8, N_pad), out_dtype),
            grid_spec=pl.GridSpec(
                grid=(grid_m,),
                in_specs=[
                    # streamed, double-buffered x tiles along M (ragged last tile OK:
                    # rows are independent, OOB output writes are dropped)
                    pl.BlockSpec((tm_eff, hidden), lambda i: (i, 0)),
                    # weight & bias: constant block index -> VMEM-resident,
                    # single-buffered when the backend supports Buffered(1)
                    pl.BlockSpec((hidden, N_pad), lambda i: (0, 0), **const_kwargs),
                    pl.BlockSpec((1, N_pad), lambda i: (0, 0), **const_kwargs),
                ],
                out_specs=pl.BlockSpec((tm_eff, N_pad), lambda i: (i, 0)),
            ),
            compiler_params=pltpu.CompilerParams(
                dimension_semantics=("parallel",),  # M tiles are independent
                vmem_limit_bytes=vmem_limit,
            ),
            cost_estimate=cost,
        )

    try:
        out2d = build(pl.Buffered(1))(x2d, w_t, b2d)
    except Exception:
        # fallback: default double-buffering for the constant weight/bias blocks
        out2d = build(None)(x2d, w_t, b2d)

    # TODO(synk): downstream consumers (loss/argmax) could take the padded (M8, 128)
    # slab directly and avoid this materializing slice; kept to match the module API.
    return out2d[:M, :num_labels].reshape(batch, seq, num_labels)


if __name__ == "__main__":
    key = jax.random.PRNGKey(0)
    k_x, k_w, k_b = jax.random.split(key, 3)

    batch, seq, hidden = 2, 8, 32
    num_labels = NUM_SLOT_LABELS

    # deterministic synthetic parameters (nn.Linear-style uniform init bound)
    bound = 1.0 / (hidden ** 0.5)
    x = jax.random.normal(k_x, (batch, seq, hidden), dtype=jnp.float32)
    weight = jax.random.uniform(k_w, (num_labels, hidden), dtype=jnp.float32,
                                minval=-bound, maxval=bound)
    bias = jax.random.uniform(k_b, (num_labels,), dtype=jnp.float32,
                              minval=-bound, maxval=bound)

    out = slot_classifier_forward(x, weight, bias)
    out = jax.block_until_ready(out)

    # reference check (plain JAX) to validate the kernel semantics
    ref = x @ weight.T + bias
    assert out.shape == (batch, seq, num_labels)
    assert jnp.allclose(out, ref, atol=1e-5, rtol=1e-5)

    print("KERNEL_OK")
</pallas_src>

<mosaic_0001>
module attributes {stable_mosaic.version = 11 : i64} {
  func.func @_slot_classifier_kernel(%arg0: i32, %arg1: memref<8x32xf32, #tpu.memory_space<vmem>>, %arg2: memref<32x128xf32, #tpu.memory_space<vmem>>, %arg3: memref<1x128xf32, #tpu.memory_space<vmem>>, %arg4: memref<8x128xf32, #tpu.memory_space<vmem>>) attributes {dimension_semantics = [#tpu.dimension_semantics<parallel>], iteration_bounds = array<i64: 2>, scalar_prefetch = 0 : i64, scratch_operands = 0 : i64, tpu.core_type = #tpu.core_type<tc>, window_params = [{transform_indices = @transform_0, window_bounds = array<i64: 8, 32>}, {pipeline_mode = #tpu.pipeline_mode<synchronous>, transform_indices = @transform_1, window_bounds = array<i64: 32, 128>}, {pipeline_mode = #tpu.pipeline_mode<synchronous>, transform_indices = @transform_2, window_bounds = array<i64: 1, 128>}, {transform_indices = @transform_3, window_bounds = array<i64: 8, 128>}]} {
    %c0 = arith.constant 0 : index
    %c0_0 = arith.constant 0 : index
    %0 = vector.load %arg1[%c0, %c0_0] : memref<8x32xf32, #tpu.memory_space<vmem>>, vector<8x32xf32>
    %c0_1 = arith.constant 0 : index
    %c0_2 = arith.constant 0 : index
    %1 = vector.load %arg2[%c0_1, %c0_2] : memref<32x128xf32, #tpu.memory_space<vmem>>, vector<32x128xf32>
    %cst = arith.constant dense<0.000000e+00> : vector<8x128xf32>
    %2 = tpu.matmul %0, %1, %cst {dimension_numbers = #tpu.dot_dimension_numbers<[1], [0], [0], [1], [0, 0, 1, 1], [], []>} : vector<8x32xf32>, vector<32x128xf32>, vector<8x128xf32> -> vector<8x128xf32>
    %c0_3 = arith.constant 0 : index
    %c0_4 = arith.constant 0 : index
    %3 = vector.load %arg3[%c0_3, %c0_4] : memref<1x128xf32, #tpu.memory_space<vmem>>, vector<1x128xf32>
    %4 = vector.broadcast %3 : vector<1x128xf32> to vector<8x128xf32>
    %5 = arith.addf %2, %4 : vector<8x128xf32>
    %c0_5 = arith.constant 0 : index
    %c0_6 = arith.constant 0 : index
    %6 = vector.load %arg4[%c0_5, %c0_6] : memref<8x128xf32, #tpu.memory_space<vmem>>, vector<8x128xf32>
    tpu.vector_store %arg4[%c0_5, %c0_6], %5 {strides = array<i32>} : memref<8x128xf32, #tpu.memory_space<vmem>>, vector<8x128xf32>,
    return
  }
  func.func @transform_0(%arg0: i32) -> (i32, i32) {
    %c0_i32 = arith.constant 0 : i32
    %c0_i32_0 = arith.constant 0 : i32
    return %arg0, %c0_i32 : i32, i32
  }
  func.func @transform_1(%arg0: i32) -> (i32, i32) {
    %c0_i32 = arith.constant 0 : i32
    %c0_i32_0 = arith.constant 0 : i32
    %c0_i32_1 = arith.constant 0 : i32
    return %c0_i32, %c0_i32_0 : i32, i32
  }
  func.func @transform_2(%arg0: i32) -> (i32, i32) {
    %c0_i32 = arith.constant 0 : i32
    %c0_i32_0 = arith.constant 0 : i32
    %c0_i32_1 = arith.constant 0 : i32
    return %c0_i32, %c0_i32_0 : i32, i32
  }
  func.func @transform_3(%arg0: i32) -> (i32, i32) {
    %c0_i32 = arith.constant 0 : i32
    %c0_i32_0 = arith.constant 0 : i32
    return %arg0, %c0_i32 : i32, i32
  }
}

module attributes {stable_mosaic.version = 11 : i64} {
  func.func @_slot_classifier_kernel(%arg0: i32, %arg1: memref<8x32xf32, #tpu.memory_space<vmem>>, %arg2: memref<32x128xf32, #tpu.memory_space<vmem>>, %arg3: memref<1x128xf32, #tpu.memory_space<vmem>>, %arg4: memref<8x128xf32, #tpu.memory_space<vmem>>) attributes {dimension_semantics = [#tpu.dimension_semantics<parallel>], iteration_bounds = array<i64: 2>, scalar_prefetch = 0 : i64, scratch_operands = 0 : i64, tpu.core_type = #tpu.core_type<tc>, window_params = [{transform_indices = @transform_0, window_bounds = array<i64: 8, 32>}, {pipeline_mode = #tpu.pipeline_mode<synchronous>, transform_indices = @transform_1, window_bounds = array<i64: 32, 128>}, {pipeline_mode = #tpu.pipeline_mode<synchronous>, transform_indices = @transform_2, window_bounds = array<i64: 1, 128>}, {transform_indices = @transform_3, window_bounds = array<i64: 8, 128>}]} {
    %c0 = arith.constant 0 : index
    %c0_0 = arith.constant 0 : index
    %0 = vector.load %arg1[%c0, %c0_0] : memref<8x32xf32, #tpu.memory_space<vmem>>, vector<8x32xf32>
    %c0_1 = arith.constant 0 : index
    %c0_2 = arith.constant 0 : index
    %1 = vector.load %arg2[%c0_1, %c0_2] : memref<32x128xf32, #tpu.memory_space<vmem>>, vector<32x128xf32>
    %cst = arith.constant dense<0.000000e+00> : vector<8x128xf32>
    %2 = tpu.matmul %0, %1, %cst {dimension_numbers = #tpu.dot_dimension_numbers<[1], [0], [0], [1], [0, 0, 1, 1], [], []>} : vector<8x32xf32>, vector<32x128xf32>, vector<8x128xf32> -> vector<8x128xf32>
    %c0_3 = arith.constant 0 : index
    %c0_4 = arith.constant 0 : index
    %3 = vector.load %arg3[%c0_3, %c0_4] : memref<1x128xf32, #tpu.memory_space<vmem>>, vector<1x128xf32>
    %4 = vector.broadcast %3 : vector<1x128xf32> to vector<8x128xf32>
    %5 = arith.addf %2, %4 : vector<8x128xf32>
    %c0_5 = arith.constant 0 : index
    %c0_6 = arith.constant 0 : index
    %6 = vector.load %arg4[%c0_5, %c0_6] : memref<8x128xf32, #tpu.memory_space<vmem>>, vector<8x128xf32>
    tpu.vector_store %arg4[%c0_5, %c0_6], %5 {strides = array<i32>} : memref<8x128xf32, #tpu.memory_space<vmem>>, vector<8x128xf32>,
    return
  }
  func.func @transform_0(%arg0: i32) -> (i32, i32) {
    %c0_i32 = arith.constant 0 : i32
    %c0_i32_0 = arith.constant 0 : i32
    return %arg0, %c0_i32 : i32, i32
  }
  func.func @transform_1(%arg0: i32) -> (i32, i32) {
    %c0_i32 = arith.constant 0 : i32
    %c0_i32_0 = arith.constant 0 : i32
    %c0_i32_1 = arith.constant 0 : i32
    return %c0_i32, %c0_i32_0 : i32, i32
  }
  func.func @transform_2(%arg0: i32) -> (i32, i32) {
    %c0_i32 = arith.constant 0 : i32
    %c0_i32_0 = arith.constant 0 : i32
    %c0_i32_1 = arith.constant 0 : i32
    return %c0_i32, %c0_i32_0 : i32, i32
  }
  func.func @transform_3(%arg0: i32) -> (i32, i32) {
    %c0_i32 = arith.constant 0 : i32
    %c0_i32_0 = arith.constant 0 : i32
    return %arg0, %c0_i32 : i32, i32
  }
}

</mosaic_0001>

<bundles_post_ra>
// kernel: tpu_custom_call.1
= control target key start
LH: loop header
LB: loop body
LE: loop exit
PB: predicated region body
PF: predicated region fallthrough
CT: control target
= control target key end

     0   :  { %8 = vsyncpa [#allocation3], 0  ;;  %s789_s0 = inlined_call_operand.hbm [shape: f32[16,32], index: 0, kind: input, shape index: {}]   ;;  %s790_s1 = inlined_call_operand.hbm [shape: f32[32,128], index: 1, kind: input, shape index: {}]   ;;  %s791_s2 = inlined_call_operand.vmem [shape: f32[1,128], index: 2, kind: input, shape index: {}]   ;;  %s792_s3 = inlined_call_operand.hbm [shape: f32[16,128], index: 3, kind: output, shape index: {}]  }
   0x1   :  { %10 = vsyncpa [#allocation3 + $0x1], 0 }
   0x2   :  { %11 = vsyncpa [#allocation6], 0 }
   0x3   :  { %12 = vsyncpa [#allocation4], 0 }
   0x4   :  { %14 = vsyncpa [#allocation4 + $0x1], 0  ;;  %s626_s12 = smov 0   ;;  %s628_s13 = smov 0  }
   0x5   :  { %s630_s14 = smov 0   ;;  %s632_s15 = smov 0  }
   0x6 LB: > { %s647_s16 = sadd.s32 4294967295, %s597_s15   ;;  %s382_s17 = sadd.s32 4294967294, %s597_s15   ;;  %s597_s15 = sphi %s632_s15, %s814_s15   ;;  %s593_s14 = sphi %s630_s14, %s813_s14   ;;  %s589_s13 = sphi %s628_s13, %s812_s13   ;;  %s585_s12 = sphi %s626_s12, %s811_s12  }
   0x7   : > { %p40_p0 = scmp.ne.s32.totalorder %s589_s13, %s585_s12  ;;  %p793_p1 = scmp.eq.s32.totalorder %s647_s16, 0 }
   0x8   : > { %p112_p3 = scmp.eq.s32.totalorder %s382_s17, 1  ;;  %p383_p5 = scmp.ge.s32.totalorder %s597_s15, 1 }
   0x9   : > { %p656_p4 = por %p793_p1, %p40_p0  ;;  %p119_p7 = scmp.lt.s32.totalorder %s597_s15, 3 }
   0xa   : > { %p661_p6 = por %p112_p3, %p40_p0  ;;  %s599_s21 = smov [#allocation5]  }
   0xb   : > { %s797_s18 = scalar_select %p656_p4, 1, 0 }
   0xc   : > { %s798_s19 = scalar_select %p661_p6, 1, 0 }
   0xd   : > { %p666_p8 = pnand %p383_p5, %p119_p7  ;;  %s131_s22 = sshll.u32 %s599_s21, 4  ;;  %s132_s22 = int_to_ptr.vmem [resolvable:$true] %s131_s22 }
   0xe   : > { %s680_s24 = sadd.s32 1, %s597_s15   ;;  %s27_s25 = sadd.s32 1, %s593_s14 }
   0xf   : > { %s799_s20 = scalar_select %p666_p8, 1, 0 }
  0x10   : > { %p422_p9 = pneg %p666_p8  ;;  %s24_s26 = ssub.s32 %s597_s15, %s680_s24 }
  0x11   : > { %s486_s27 = scalar_lea.vmem %s132_s22, 512  ;;  %p494_p5 = scmp.lt.s32.totalorder %s132_s22, %s132_s22 }
  0x12   : > { %p675_p11 = pnand %p422_p9, %p793_p1  ;;  %p487_p13 = scmp.ne.s32.totalorder %s132_s22, %s486_s27 }
  0x13   : > { %p495_p7 = scmp.lt.s32.totalorder %s486_s27, %s486_s27 }
  0x14   : > { %p477_p12 = pneg %p675_p11 }
  0x15   : > { %p496_p10 = por %p495_p7, %p494_p5 }
  0x16   : > { %p489_p0 = pnand %p487_p13, %p477_p12 }
  0x18   : > { %p490_p3 = pneg %p489_p0 }
  0x1a   : > { %p497_p2 = pnand %p496_p10, %p490_p3 }
  0x1c   : > { %500 = shalt.err (!%p497_p2)
}
  0x1d   : > { %s600_s28 = smov 128   ;;  %s601_s29 = smov 8  }
  0x1e   : > { %425 = dma.hbm_to_vmem [thread:$0]  (!%p675_p11), %s790_s1, 512, %s132_s22, [#allocation6], %s600_s28, %s600_s28, %s601_s29  }
  0x1f   : > { %p25_p9 = scmp.eq.s32.totalorder %s24_s26, 0  ;;  %p34_p12 = scmp.ne.s32.totalorder %s593_s14, %s589_s13 }
  0x20   : > { %p35_p10 = scmp.eq.s32.totalorder %s597_s15, 0  ;;  %p435_p2 = scmp.lt.s32.totalorder %s597_s15, 2 }
  0x21   : > { %s697_s5 = scalar_select %p25_p9, %s593_s14, %s27_s25  }
  0x22   : > { %p36_p13 = por %p35_p10, %p34_p12  ;;  %p801_p0 = scmp.eq.s32.totalorder %s647_s16, 1 }
  0x23   : > { %s148_s7 = sand.u32 1, %s593_s14   ;;  %s387_s8 = sshll.u32 %s597_s15, 7 }
  0x24   : > { %p701_p3 = por %p801_p0, %p34_p12  ;;  %s386_s9 = sshll.u32 %s148_s7, 3 }
  0x25   : > { %s710_s17 = scalar_lea.hbm %s789_s0, %s387_s8  ;;  %s152_s21 = scalar_lea.vmem [#allocation2], %s386_s9 }
  0x26   : > { %s802_s6 = scalar_select %p701_p3, 1, 0 }
  0x27   : > { %s159_s22 = sshll.u32 %s152_s21, 4  ;;  %p712_p11 = pnand %p435_p2, %p36_p13  ;;  %s160_s22 = int_to_ptr.vmem [resolvable:$true] %s159_s22 }
  0x28   : > { %s149_s25 = scalar_lea.sflag [#allocation3], %s148_s7  ;;  %s501_s26 = scalar_lea.hbm %s710_s17, 128 }
  0x29   : > { %p502_p5 = scmp.ne.s32.totalorder %s710_s17, %s501_s26  ;;  %p503_p7 = pneg %p712_p11 }
  0x2a   : > { %s506_s29 = scalar_lea.hbm %s789_s0, 256  ;;  %p507_p10 = scmp.lt.s32.totalorder %s710_s17, %s789_s0 }
  0x2b   : > { %p504_p9 = pnand %p503_p7, %p502_p5  ;;  %p508_p2 = scmp.lt.s32.totalorder %s506_s29, %s501_s26 }
  0x2d   : > { %p505_p12 = pneg %p504_p9  ;;  %p509_p13 = por %p508_p2, %p507_p10 }
  0x2f   : > { %p510_p0 = pnand %p509_p13, %p505_p12 }
  0x31   : > { %513 = shalt.err (!%p510_p0)
}
  0x32   : > { %s514_s8 = scalar_lea.vmem %s160_s22, 128  ;;  %s602_s7 = smov [#allocation2]  }
  0x33   : > { %p515_p1 = scmp.ne.s32.totalorder %s160_s22, %s514_s8  ;;  %s519_s9 = sshll.u32 %s602_s7, 4  ;;  %s520_s9 = int_to_ptr.vmem [resolvable:$false] %s519_s9 }
  0x34   : > { %s521_s10 = scalar_lea.vmem %s520_s9, 256  ;;  %p522_p5 = scmp.lt.s32.totalorder %s160_s22, %s520_s9 }
  0x35   : > { %p517_p6 = pnand %p515_p1, %p503_p7  ;;  %p523_p9 = scmp.lt.s32.totalorder %s521_s10, %s514_s8 }
  0x37   : > { %p518_p3 = pneg %p517_p6  ;;  %p524_p4 = por %p523_p9, %p522_p5 }
  0x39   : > { %p525_p8 = pnand %p524_p4, %p518_p3 }
  0x3b   : > { %528 = shalt.err (!%p525_p8)
}
  0x3c   : > { %429 = dma.hbm_to_vmem [thread:$0]  (!%p712_p11), %s710_s17, 128, %s160_s22, %s149_s25  }
  0x3d   : > { %p804_p12 = scmp.ne.s32.totalorder %s799_s20, 0 }
  0x3e   : > { %s733_s11 = sand.u32 (!%p804_p12), 1, %s589_s13   ;;  %p805_p1 = scmp.ne.s32.totalorder (!%p804_p12), %s797_s18, 0 }
  0x3f   : > { %168 = sbr.rel (%p804_p12) target bundleno = 289 (0x121), region = 32  ;;  %s389_s21 = sshll.u32 (!%p804_p12), %s733_s11, 3 }
  0x40   : > { %s171_s26 = scalar_lea.sflag (!%p804_p12), [#allocation3], %s733_s11  ;;  %s174_s27 = scalar_lea.vmem (!%p804_p12), [#allocation2], %s389_s21 }
  0x44   : > { %572 = dma.done.wait (%p805_p1), %s171_s26, 128  }
  0x45   : > { %574 = vsyncadd (%p805_p1), %s171_s26, 4294967168  ;;  %p806_p4 = scmp.eq.s32.totalorder %s647_s16, 0 }
  0x47   : > { %576 = dma.done.wait (%p806_p4), [#allocation6], 512   ;;  %p807_p6 = pmov %p806_p4 }
  0x48   : > { %v603_v0 = vmov 0.0   ;;  %vm604_vm0 = vmmov 0   ;;  %v205_v1 = vld [vmem:[#allocation5 + $0x18] sm:$0xff]  ;;  %v204_v2 = vld [vmem:[#allocation5 + $0x10] sm:$0xff]  ;;  %v203_v3 = vld [vmem:[#allocation5 + $0x8] sm:$0xff]  ;;  %vm213_vm1 = vcmask 261120  }
  0x49   : > { %578 = vsyncadd (%p807_p6), [#allocation6], 4294966784  ;;  %403 = vmatprep.subr.mxu0 %v603_v0  ;;  %411 = vmatprep.mubr.msk.f32.mxu0 %vm604_vm0, %v603_v0  ;;  %v202_v4 = vld [vmem:[#allocation5] sm:$0xff]  ;;  %v201_v5 = vld [vmem:[%s174_s27] sm:$0xff]  ;;  %s395_s17 = sshll.u32 %s647_s16, 7  ;;  %s200_s22 = scalar_lea.vmem [#allocation7], %s389_s21 }
  0x4a   : > { %404 = vmatpush3.msra.mxu0 %v205_v1  ;;  %v392_v6 = vld [vmem:[%s791_s2] ss:$0 sm:$0xff]  ;;  %s302_s23 = sshll.u32 %s200_s22, 4  ;;  %s752_s29 = scalar_lea.hbm %s792_s3, %s395_s17  ;;  %s303_s23 = int_to_ptr.vmem [resolvable:$true] %s302_s23 }
  0x4b   : > { %405 = vmatprep.subr.mxu0 %v603_v0  ;;  %s289_s30 = scalar_lea.sflag [#allocation4], %s733_s11  ;;  %s529_s4 = scalar_lea.vmem %s303_s23, 128 }
  0x4c   : > { %406 = vmatpush3.msra.mxu0 %v204_v2  ;;  %p530_p8 = scmp.ne.s32.totalorder %s303_s23, %s529_s4  ;;  %p808_p3 = scmp.ne.s32.totalorder %s802_s6, 0 }
  0x4d   : > { %407 = vmatprep.subr.mxu0 %v603_v0  ;;  %s605_s8 = smov [#allocation7]  }
  0x4e   : > { %408 = vmatpush3.msra.mxu0 %v203_v3  ;;  %p531_p11 = pnand %p530_p8, %p808_p3  ;;  %s533_s16 = sshll.u32 %s605_s8, 4  ;;  %s534_s16 = int_to_ptr.vmem [resolvable:$false] %s533_s16 }
  0x4f   : > { %409 = vmatprep.subr.mxu0 %v603_v0  ;;  %s535_s7 = scalar_lea.vmem %s534_s16, 256  ;;  %p536_p10 = scmp.lt.s32.totalorder %s303_s23, %s534_s16 }
  0x50   : > { %410 = vmatpush3.msra.mxu0 %v202_v4  ;;  %p532_p7 = pneg %p531_p11  ;;  %p537_p2 = scmp.lt.s32.totalorder %s535_s7, %s529_s4 }
  0x51   : > { %412 = vmatmul.mubr.msk.f32.vlgmr.msra.gmra.mxu0 %vm213_vm1, %v201_v5 }
  0x52   : > { %p538_p13 = por %p537_p2, %p536_p10 }
  0x54   : > { %p539_p0 = pnand %p538_p13, %p532_p7 }
 0x111   : > { %v283_v7 = vpop.f32.mrf.mxu0 }
 0x112   : > { %v284_v8 = vadd.f32 %v392_v6, %v283_v7 }
 0x113   : > { %v413_v9 = vpop.f32.mrf.mxu0 }
 0x114   : > { %287 = vst [vmem:[%s200_s22] sm:$0xff] %v284_v8 }
 0x115   : > { %542 = shalt.err (!%p539_p0)
}
 0x116   : > { %s543_s9 = scalar_lea.hbm %s752_s29, 128  ;;  %s547_s21 = scalar_lea.hbm %s792_s3, 256 }
 0x117   : > { %p544_p5 = scmp.ne.s32.totalorder %s752_s29, %s543_s9  ;;  %p548_p1 = scmp.lt.s32.totalorder %s752_s29, %s792_s3 }
 0x118   : > { %p549_p4 = scmp.lt.s32.totalorder %s547_s21, %s543_s9 }
 0x119   : > { %p545_p9 = pnand %p544_p5, %p808_p3 }
 0x11a   : > { %p550_p6 = por %p549_p4, %p548_p1 }
 0x11b   : > { %p546_p12 = pneg %p545_p9 }
 0x11d   : > { %p551_p8 = pnand %p550_p6, %p546_p12 }
 0x11f   : > { %554 = shalt.err (!%p551_p8)
}
 0x120   : > { %420 = dma.vmem_to_hbm [thread:$0]  (%p808_p3), %s303_s23, 128, %s752_s29, %s289_s30  }
 0x121 PF: > { %s314_s18 = sand.u32 1, %s585_s12   ;;  %p809_p11 = scmp.ne.s32.totalorder %s798_s19, 0 }
 0x122   : > { %p810_p7 = scmp.ge.s32.totalorder %s597_s15, 2  ;;  %s315_s20 = scalar_lea.sflag [#allocation4], %s314_s18 }
 0x124   : > { %p431_p10 = pnand %p810_p7, %p809_p11 }
 0x126   : > { %p432_p2 = pneg %p431_p10 }
 0x128   : > { %580 = dma.done.wait (%p432_p2), %s315_s20, 128  }
 0x129   : > { %582 = vsyncadd (%p432_p2), %s315_s20, 4294967168  ;;  %p17_p13 = scmp.ge.s32.totalorder %s680_s24, 4   ;;  %s811_s12 = smov %s589_s13 }
 0x12a   : > { %s812_s13 = smov %s593_s14  ;;  %s813_s14 = smov %s697_s5 }
 0x12b   : > { %s814_s15 = smov %s680_s24  ;;  %19 = sbr.rel (!%p17_p13) target bundleno = 6 (0x6), region = 81 }
 0x130   :  { %320 = vsyncpa [#allocation3], 1 }
 0x131   :  { %322 = vsyncpa [#allocation3 + $0x1], 1 }
 0x132   :  { %323 = vsyncpa [#allocation6], 1 }
 0x133   :  { %324 = vsyncpa [#allocation4], 1 }
 0x134   :  { %326 = vsyncpa [#allocation4 + $0x1], 1 }

// kernel: tpu_custom_call.1
= control target key start
LH: loop header
LB: loop body
LE: loop exit
PB: predicated region body
PF: predicated region fallthrough
CT: control target
= control target key end

     0   :  { %8 = vsyncpa [#allocation3], 0  ;;  %s789_s0 = inlined_call_operand.hbm [shape: f32[16,32], index: 0, kind: input, shape index: {}]   ;;  %s790_s1 = inlined_call_operand.hbm [shape: f32[32,128], index: 1, kind: input, shape index: {}]   ;;  %s791_s2 = inlined_call_operand.vmem [shape: f32[1,128], index: 2, kind: input, shape index: {}]   ;;  %s792_s3 = inlined_call_operand.hbm [shape: f32[16,128], index: 3, kind: output, shape index: {}]  }
   0x1   :  { %10 = vsyncpa [#allocation3 + $0x1], 0 }
   0x2   :  { %11 = vsyncpa [#allocation6], 0 }
   0x3   :  { %12 = vsyncpa [#allocation4], 0 }
   0x4   :  { %14 = vsyncpa [#allocation4 + $0x1], 0  ;;  %s626_s12 = smov 0   ;;  %s628_s13 = smov 0  }
   0x5   :  { %s630_s14 = smov 0   ;;  %s632_s15 = smov 0  }
   0x6 LB: > { %s647_s16 = sadd.s32 4294967295, %s597_s15   ;;  %s382_s17 = sadd.s32 4294967294, %s597_s15   ;;  %s597_s15 = sphi %s632_s15, %s814_s15   ;;  %s593_s14 = sphi %s630_s14, %s813_s14   ;;  %s589_s13 = sphi %s628_s13, %s812_s13   ;;  %s585_s12 = sphi %s626_s12, %s811_s12  }
   0x7   : > { %p40_p0 = scmp.ne.s32.totalorder %s589_s13, %s585_s12  ;;  %p793_p1 = scmp.eq.s32.totalorder %s647_s16, 0 }
   0x8   : > { %p112_p3 = scmp.eq.s32.totalorder %s382_s17, 1  ;;  %p383_p5 = scmp.ge.s32.totalorder %s597_s15, 1 }
   0x9   : > { %p656_p4 = por %p793_p1, %p40_p0  ;;  %p119_p7 = scmp.lt.s32.totalorder %s597_s15, 3 }
   0xa   : > { %p661_p6 = por %p112_p3, %p40_p0  ;;  %s599_s21 = smov [#allocation5]  }
   0xb   : > { %s797_s18 = scalar_select %p656_p4, 1, 0 }
   0xc   : > { %s798_s19 = scalar_select %p661_p6, 1, 0 }
   0xd   : > { %p666_p8 = pnand %p383_p5, %p119_p7  ;;  %s131_s22 = sshll.u32 %s599_s21, 4  ;;  %s132_s22 = int_to_ptr.vmem [resolvable:$true] %s131_s22 }
   0xe   : > { %s680_s24 = sadd.s32 1, %s597_s15   ;;  %s27_s25 = sadd.s32 1, %s593_s14 }
   0xf   : > { %s799_s20 = scalar_select %p666_p8, 1, 0 }
  0x10   : > { %p422_p9 = pneg %p666_p8  ;;  %s24_s26 = ssub.s32 %s597_s15, %s680_s24 }
  0x11   : > { %s486_s27 = scalar_lea.vmem %s132_s22, 512  ;;  %p494_p5 = scmp.lt.s32.totalorder %s132_s22, %s132_s22 }
  0x12   : > { %p675_p11 = pnand %p422_p9, %p793_p1  ;;  %p487_p13 = scmp.ne.s32.totalorder %s132_s22, %s486_s27 }
  0x13   : > { %p495_p7 = scmp.lt.s32.totalorder %s486_s27, %s486_s27 }
  0x14   : > { %p477_p12 = pneg %p675_p11 }
  0x15   : > { %p496_p10 = por %p495_p7, %p494_p5 }
  0x16   : > { %p489_p0 = pnand %p487_p13, %p477_p12 }
  0x18   : > { %p490_p3 = pneg %p489_p0 }
  0x1a   : > { %p497_p2 = pnand %p496_p10, %p490_p3 }
  0x1c   : > { %500 = shalt.err (!%p497_p2)
}
  0x1d   : > { %s600_s28 = smov 128   ;;  %s601_s29 = smov 8  }
  0x1e   : > { %425 = dma.hbm_to_vmem [thread:$0]  (!%p675_p11), %s790_s1, 512, %s132_s22, [#allocation6], %s600_s28, %s600_s28, %s601_s29  }
  0x1f   : > { %p25_p9 = scmp.eq.s32.totalorder %s24_s26, 0  ;;  %p34_p12 = scmp.ne.s32.totalorder %s593_s14, %s589_s13 }
  0x20   : > { %p35_p10 = scmp.eq.s32.totalorder %s597_s15, 0  ;;  %p435_p2 = scmp.lt.s32.totalorder %s597_s15, 2 }
  0x21   : > { %s697_s5 = scalar_select %p25_p9, %s593_s14, %s27_s25  }
  0x22   : > { %p36_p13 = por %p35_p10, %p34_p12  ;;  %p801_p0 = scmp.eq.s32.totalorder %s647_s16, 1 }
  0x23   : > { %s148_s7 = sand.u32 1, %s593_s14   ;;  %s387_s8 = sshll.u32 %s597_s15, 7 }
  0x24   : > { %p701_p3 = por %p801_p0, %p34_p12  ;;  %s386_s9 = sshll.u32 %s148_s7, 3 }
  0x25   : > { %s710_s17 = scalar_lea.hbm %s789_s0, %s387_s8  ;;  %s152_s21 = scalar_lea.vmem [#allocation2], %s386_s9 }
  0x26   : > { %s802_s6 = scalar_select %p701_p3, 1, 0 }
  0x27   : > { %s159_s22 = sshll.u32 %s152_s21, 4  ;;  %p712_p11 = pnand %p435_p2, %p36_p13  ;;  %s160_s22 = int_to_ptr.vmem [resolvable:$true] %s159_s22 }
  0x28   : > { %s149_s25 = scalar_lea.sflag [#allocation3], %s148_s7  ;;  %s501_s26 = scalar_lea.hbm %s710_s17, 128 }
  0x29   : > { %p502_p5 = scmp.ne.s32.totalorder %s710_s17, %s501_s26  ;;  %p503_p7 = pneg %p712_p11 }
  0x2a   : > { %s506_s29 = scalar_lea.hbm %s789_s0, 256  ;;  %p507_p10 = scmp.lt.s32.totalorder %s710_s17, %s789_s0 }
  0x2b   : > { %p504_p9 = pnand %p503_p7, %p502_p5  ;;  %p508_p2 = scmp.lt.s32.totalorder %s506_s29, %s501_s26 }
  0x2d   : > { %p505_p12 = pneg %p504_p9  ;;  %p509_p13 = por %p508_p2, %p507_p10 }
  0x2f   : > { %p510_p0 = pnand %p509_p13, %p505_p12 }
  0x31   : > { %513 = shalt.err (!%p510_p0)
}
  0x32   : > { %s514_s8 = scalar_lea.vmem %s160_s22, 128  ;;  %s602_s7 = smov [#allocation2]  }
  0x33   : > { %p515_p1 = scmp.ne.s32.totalorder %s160_s22, %s514_s8  ;;  %s519_s9 = sshll.u32 %s602_s7, 4  ;;  %s520_s9 = int_to_ptr.vmem [resolvable:$false] %s519_s9 }
  0x34   : > { %s521_s10 = scalar_lea.vmem %s520_s9, 256  ;;  %p522_p5 = scmp.lt.s32.totalorder %s160_s22, %s520_s9 }
  0x35   : > { %p517_p6 = pnand %p515_p1, %p503_p7  ;;  %p523_p9 = scmp.lt.s32.totalorder %s521_s10, %s514_s8 }
  0x37   : > { %p518_p3 = pneg %p517_p6  ;;  %p524_p4 = por %p523_p9, %p522_p5 }
  0x39   : > { %p525_p8 = pnand %p524_p4, %p518_p3 }
  0x3b   : > { %528 = shalt.err (!%p525_p8)
}
  0x3c   : > { %429 = dma.hbm_to_vmem [thread:$0]  (!%p712_p11), %s710_s17, 128, %s160_s22, %s149_s25  }
  0x3d   : > { %p804_p12 = scmp.ne.s32.totalorder %s799_s20, 0 }
  0x3e   : > { %s733_s11 = sand.u32 (!%p804_p12), 1, %s589_s13   ;;  %p805_p1 = scmp.ne.s32.totalorder (!%p804_p12), %s797_s18, 0 }
  0x3f   : > { %168 = sbr.rel (%p804_p12) target bundleno = 289 (0x121), region = 32  ;;  %s389_s21 = sshll.u32 (!%p804_p12), %s733_s11, 3 }
  0x40   : > { %s171_s26 = scalar_lea.sflag (!%p804_p12), [#allocation3], %s733_s11  ;;  %s174_s27 = scalar_lea.vmem (!%p804_p12), [#allocation2], %s389_s21 }
  0x44   : > { %572 = dma.done.wait (%p805_p1), %s171_s26, 128  }
  0x45   : > { %574 = vsyncadd (%p805_p1), %s171_s26, 4294967168  ;;  %p806_p4 = scmp.eq.s32.totalorder %s647_s16, 0 }
  0x47   : > { %576 = dma.done.wait (%p806_p4), [#allocation6], 512   ;;  %p807_p6 = pmov %p806_p4 }
  0x48   : > { %v603_v0 = vmov 0.0   ;;  %vm604_vm0 = vmmov 0   ;;  %v205_v1 = vld [vmem:[#allocation5 + $0x18] sm:$0xff]  ;;  %v204_v2 = vld [vmem:[#allocation5 + $0x10] sm:$0xff]  ;;  %v203_v3 = vld [vmem:[#allocation5 + $0x8] sm:$0xff]  ;;  %vm213_vm1 = vcmask 261120  }
  0x49   : > { %578 = vsyncadd (%p807_p6), [#allocation6], 4294966784  ;;  %403 = vmatprep.subr.mxu0 %v603_v0  ;;  %411 = vmatprep.mubr.msk.f32.mxu0 %vm604_vm0, %v603_v0  ;;  %v202_v4 = vld [vmem:[#allocation5] sm:$0xff]  ;;  %v201_v5 = vld [vmem:[%s174_s27] sm:$0xff]  ;;  %s395_s17 = sshll.u32 %s647_s16, 7  ;;  %s200_s22 = scalar_lea.vmem [#allocation7], %s389_s21 }
  0x4a   : > { %404 = vmatpush3.msra.mxu0 %v205_v1  ;;  %v392_v6 = vld [vmem:[%s791_s2] ss:$0 sm:$0xff]  ;;  %s302_s23 = sshll.u32 %s200_s22, 4  ;;  %s752_s29 = scalar_lea.hbm %s792_s3, %s395_s17  ;;  %s303_s23 = int_to_ptr.vmem [resolvable:$true] %s302_s23 }
  0x4b   : > { %405 = vmatprep.subr.mxu0 %v603_v0  ;;  %s289_s30 = scalar_lea.sflag [#allocation4], %s733_s11  ;;  %s529_s4 = scalar_lea.vmem %s303_s23, 128 }
  0x4c   : > { %406 = vmatpush3.msra.mxu0 %v204_v2  ;;  %p530_p8 = scmp.ne.s32.totalorder %s303_s23, %s529_s4  ;;  %p808_p3 = scmp.ne.s32.totalorder %s802_s6, 0 }
  0x4d   : > { %407 = vmatprep.subr.mxu0 %v603_v0  ;;  %s605_s8 = smov [#allocation7]  }
  0x4e   : > { %408 = vmatpush3.msra.mxu0 %v203_v3  ;;  %p531_p11 = pnand %p530_p8, %p808_p3  ;;  %s533_s16 = sshll.u32 %s605_s8, 4  ;;  %s534_s16 = int_to_ptr.vmem [resolvable:$false] %s533_s16 }
  0x4f   : > { %409 = vmatprep.subr.mxu0 %v603_v0  ;;  %s535_s7 = scalar_lea.vmem %s534_s16, 256  ;;  %p536_p10 = scmp.lt.s32.totalorder %s303_s23, %s534_s16 }
  0x50   : > { %410 = vmatpush3.msra.mxu0 %v202_v4  ;;  %p532_p7 = pneg %p531_p11  ;;  %p537_p2 = scmp.lt.s32.totalorder %s535_s7, %s529_s4 }
  0x51   : > { %412 = vmatmul.mubr.msk.f32.vlgmr.msra.gmra.mxu0 %vm213_vm1, %v201_v5 }
  0x52   : > { %p538_p13 = por %p537_p2, %p536_p10 }
  0x54   : > { %p539_p0 = pnand %p538_p13, %p532_p7 }
 0x111   : > { %v283_v7 = vpop.f32.mrf.mxu0 }
 0x112   : > { %v284_v8 = vadd.f32 %v392_v6, %v283_v7 }
 0x113   : > { %v413_v9 = vpop.f32.mrf.mxu0 }
 0x114   : > { %287 = vst [vmem:[%s200_s22] sm:$0xff] %v284_v8 }
 0x115   : > { %542 = shalt.err (!%p539_p0)
}
 0x116   : > { %s543_s9 = scalar_lea.hbm %s752_s29, 128  ;;  %s547_s21 = scalar_lea.hbm %s792_s3, 256 }
 0x117   : > { %p544_p5 = scmp.ne.s32.totalorder %s752_s29, %s543_s9  ;;  %p548_p1 = scmp.lt.s32.totalorder %s752_s29, %s792_s3 }
 0x118   : > { %p549_p4 = scmp.lt.s32.totalorder %s547_s21, %s543_s9 }
 0x119   : > { %p545_p9 = pnand %p544_p5, %p808_p3 }
 0x11a   : > { %p550_p6 = por %p549_p4, %p548_p1 }
 0x11b   : > { %p546_p12 = pneg %p545_p9 }
 0x11d   : > { %p551_p8 = pnand %p550_p6, %p546_p12 }
 0x11f   : > { %554 = shalt.err (!%p551_p8)
}
 0x120   : > { %420 = dma.vmem_to_hbm [thread:$0]  (%p808_p3), %s303_s23, 128, %s752_s29, %s289_s30  }
 0x121 PF: > { %s314_s18 = sand.u32 1, %s585_s12   ;;  %p809_p11 = scmp.ne.s32.totalorder %s798_s19, 0 }
 0x122   : > { %p810_p7 = scmp.ge.s32.totalorder %s597_s15, 2  ;;  %s315_s20 = scalar_lea.sflag [#allocation4], %s314_s18 }
 0x124   : > { %p431_p10 = pnand %p810_p7, %p809_p11 }
 0x126   : > { %p432_p2 = pneg %p431_p10 }
 0x128   : > { %580 = dma.done.wait (%p432_p2), %s315_s20, 128  }
 0x129   : > { %582 = vsyncadd (%p432_p2), %s315_s20, 4294967168  ;;  %p17_p13 = scmp.ge.s32.totalorder %s680_s24, 4   ;;  %s811_s12 = smov %s589_s13 }
 0x12a   : > { %s812_s13 = smov %s593_s14  ;;  %s813_s14 = smov %s697_s5 }
 0x12b   : > { %s814_s15 = smov %s680_s24  ;;  %19 = sbr.rel (!%p17_p13) target bundleno = 6 (0x6), region = 81 }
 0x130   :  { %320 = vsyncpa [#allocation3], 1 }
 0x131   :  { %322 = vsyncpa [#allocation3 + $0x1], 1 }
 0x132   :  { %323 = vsyncpa [#allocation6], 1 }
 0x133   :  { %324 = vsyncpa [#allocation4], 1 }
 0x134   :  { %326 = vsyncpa [#allocation4 + $0x1], 1 }

</bundles_post_ra>
